<compile_context>
chip_gen: v7x
topology: tpu7x:2x2x1
jax: 0.10.0
libtpu: 0.0.40
codegen_flags: <defaults>
</compile_context>

<pallas_src>
import functools

import jax
import jax.numpy as jnp
from jax.experimental import pallas as pl
from jax.experimental.pallas import tpu as pltpu


def _round_up(x, m):
    return ((x + m - 1) // m) * m


def _proto_dist_kernel(support_ref, q_ref, out_ref, *, inv_s):
    """Fused prototypes + negative Euclidean distances for one query tile.

    support_ref: (C, S, D)  f32/bf16 VMEM  resident across the grid
    q_ref:       (TQ, D)    bf16     VMEM  streamed / pipelined query tile
    out_ref:     (TQ, C)    f32      VMEM  -sqrt(d2)
    """
    # ---- prototypes (tiny: C*S*D elements, recomputed per tile) ------------
    sup = support_ref[...].astype(jnp.float32)                 # (C, S, D)
    protos = jnp.sum(sup, axis=1) * inv_s                      # (C, D) f32 mean
    # Values the MXU will actually see (bf16-rounded), back in f32.
    p_bf32 = protos.astype(jnp.bfloat16).astype(jnp.float32)   # (C, D)
    # Lane-dense ||p||^2 row via (1,D)x(C,D) contraction -> (1,C): no transpose.
    ones = jnp.ones((1, p_bf32.shape[1]), jnp.float32)
    psq = jax.lax.dot_general(
        ones, p_bf32 * p_bf32,
        dimension_numbers=(((1,), (1,)), ((), ())),
        preferred_element_type=jnp.float32,
    )                                                           # (1, C)
    # Fold the -2 of  d2 = ||q||^2 + ||p||^2 - 2 q.p  into the bf16 operand
    # (multiply by a power of two: exact, bit-identical to -2 * rounded p).
    neg2p_bf = (p_bf32 * (-2.0)).astype(jnp.bfloat16)           # (C, D)

    # ---- query tile ---------------------------------------------------------
    q_bf = q_ref[...]                                           # (TQ, D) bf16
    q32 = q_bf.astype(jnp.float32)
    q_sq = jnp.sum(q32 * q32, axis=-1, keepdims=True)           # (TQ, 1) f32
    # bf16 x bf16 -> f32 accumulate on the MXU; protos carry the -2 factor.
    cross = jax.lax.dot_general(
        q_bf, neg2p_bf,
        dimension_numbers=(((1,), (1,)), ((), ())),
        preferred_element_type=jnp.float32,
    )                                                           # (TQ, C)
    d2 = jnp.maximum(q_sq + psq + cross, 0.0)                   # clamp cancellation
    out_ref[...] = -jnp.sqrt(d2)


def prototypical_forward(support, query, *, tq=512):
    """-torch.cdist(query, support.mean(dim=1)) via one fused Pallas TPU kernel."""
    C, S, D = support.shape
    Q, Dq = query.shape
    assert D == Dq, "feature dims must match"

    # Few-shot sizes: the whole support set (C*S*D) fits VMEM as a single
    # resident block — no class tiling / padding needed.
    # TODO(synk): for very large support sets (>> a few MiB) tile the class
    # axis instead of keeping support fully resident.

    # Balanced query tiling; keep >= 2 grid steps (v7x megacore) when Q allows.
    n = max(pl.cdiv(Q, tq), 2 if Q > 8 else 1)
    tq_eff = _round_up(pl.cdiv(Q, n), 8)          # sublane-aligned tile rows
    q_pad = n * tq_eff

    query_bf = query.astype(jnp.bfloat16)         # halve the streamed HBM bytes
    if q_pad != Q:
        query_bf = jnp.pad(query_bf, ((0, q_pad - Q), (0, 0)))

    out = pl.pallas_call(
        functools.partial(_proto_dist_kernel, inv_s=1.0 / S),
        out_shape=jax.ShapeDtypeStruct((q_pad, C), jnp.float32),
        grid=(n,),
        in_specs=[
            # Resident support set: constant index_map -> copied to VMEM once.
            pl.BlockSpec((C, S, D), lambda i: (0, 0, 0)),
            # Streamed, auto double-buffered query tile.
            pl.BlockSpec((tq_eff, D), lambda i: (i, 0)),
        ],
        # Direct (tq_eff, C) store: no padded class columns written back.
        out_specs=pl.BlockSpec((tq_eff, C), lambda i: (i, 0)),
        compiler_params=pltpu.CompilerParams(
            # Query tiles are independent -> shard across both TCs on v7x.
            # Per-tile VMEM is a few hundred KiB: well under every
            # generation's scoped-VMEM default, no override needed.
            dimension_semantics=("parallel",)),
    )(support, query_bf)

    return out[:Q] if q_pad != Q else out


def init_embedding_params(key, embedding_dim=128):
    """Deterministic init of the (unused-in-forward) embedding MLP params.

    Mirrors nn.Sequential(nn.Linear(768, 256), nn.ReLU(),
                          nn.Linear(256, embedding_dim)) from __init__.
    """
    # TODO(synk): the embedding MLP and adapt_model() are never exercised by
    # forward(); parameters exist only for parity with the PyTorch module.
    k1, k2, k3, k4 = jax.random.split(key, 4)
    return {
        "w1": jax.random.normal(k1, (256, 768), jnp.float32) * 0.02,
        "b1": jax.random.normal(k2, (256,), jnp.float32) * 0.02,
        "w2": jax.random.normal(k3, (embedding_dim, 256), jnp.float32) * 0.02,
        "b2": jax.random.normal(k4, (embedding_dim,), jnp.float32) * 0.02,
    }


def _reference(support, query):
    protos = jnp.mean(support, axis=1)
    diff = query[:, None, :] - protos[None, :, :]
    return -jnp.sqrt(jnp.sum(diff * diff, axis=-1))


if __name__ == "__main__":
    key = jax.random.PRNGKey(0)
    k_params, k_support, k_query, k_query2 = jax.random.split(key, 4)

    embedding_dim = 128
    _ = init_embedding_params(k_params, embedding_dim)   # parity with __init__

    C, S, D = 4, 8, embedding_dim
    support = jax.random.normal(k_support, (C, S, D), jnp.float32)

    # Case 1: tiny episode (2 balanced tiles of 8 rows, no padding).
    q_small = jax.random.normal(k_query, (16, D), jnp.float32)
    out_small = jax.block_until_ready(prototypical_forward(support, q_small))
    ref_small = _reference(support, q_small)
    assert out_small.shape == (16, C)
    # Tolerance accounts for the bf16 query/prototype rounding (cross term
    # accumulates in f32; norms/sqrt are f32 of the same bf16-rounded values).
    assert jnp.allclose(out_small, ref_small, atol=5e-2, rtol=1e-2), \
        "mismatch vs reference (small)"

    # Case 2: larger query set -> 2 balanced tiles of 152 rows (4 padded rows).
    q_big = jax.random.normal(k_query2, (300, D), jnp.float32)
    out_big = jax.block_until_ready(prototypical_forward(support, q_big))
    ref_big = _reference(support, q_big)
    assert out_big.shape == (300, C)
    assert jnp.allclose(out_big, ref_big, atol=5e-2, rtol=1e-2), \
        "mismatch vs reference (large)"

    print("KERNEL_OK")
</pallas_src>

<mosaic_0001>
module attributes {stable_mosaic.version = 11 : i64} {
  func.func @_proto_dist_kernel(%arg0: i32, %arg1: memref<4x8x128xf32, #tpu.memory_space<vmem>>, %arg2: memref<8x128xbf16, #tpu.memory_space<vmem>>, %arg3: memref<8x4xf32, #tpu.memory_space<vmem>>) attributes {dimension_semantics = [#tpu.dimension_semantics<parallel>], iteration_bounds = array<i64: 2>, scalar_prefetch = 0 : i64, scratch_operands = 0 : i64, tpu.core_type = #tpu.core_type<tc>, window_params = [{pipeline_mode = #tpu.pipeline_mode<synchronous>, transform_indices = @transform_0, window_bounds = array<i64: 4, 8, 128>}, {transform_indices = @transform_1, window_bounds = array<i64: 8, 128>}, {transform_indices = @transform_2, window_bounds = array<i64: 8, 4>}]} {
    %c0 = arith.constant 0 : index
    %c0_0 = arith.constant 0 : index
    %c0_1 = arith.constant 0 : index
    %0 = vector.load %arg1[%c0, %c0_0, %c0_1] : memref<4x8x128xf32, #tpu.memory_space<vmem>>, vector<4x8x128xf32>
    %cst = arith.constant dense<0.000000e+00> : vector<4x128xf32>
    %1 = vector.multi_reduction <add>, %0, %cst [1] : vector<4x8x128xf32> to vector<4x128xf32>
    %cst_2 = arith.constant 1.250000e-01 : f32
    %2 = vector.broadcast %cst_2 : f32 to vector<4x128xf32>
    %3 = arith.mulf %1, %2 : vector<4x128xf32>
    %4 = arith.truncf %3 : vector<4x128xf32> to vector<4x128xbf16>
    %5 = arith.extf %4 : vector<4x128xbf16> to vector<4x128xf32>
    %cst_3 = arith.constant 1.000000e+00 : f32
    %6 = vector.broadcast %cst_3 : f32 to vector<1x128xf32>
    %7 = arith.mulf %5, %5 : vector<4x128xf32>
    %cst_4 = arith.constant dense<0.000000e+00> : vector<1x4xf32>
    %8 = tpu.matmul %6, %7, %cst_4 {dimension_numbers = #tpu.dot_dimension_numbers<[1], [1], [0], [0], [0, 0, 1, 0], [], []>} : vector<1x128xf32>, vector<4x128xf32>, vector<1x4xf32> -> vector<1x4xf32>
    %cst_5 = arith.constant -2.000000e+00 : f32
    %9 = vector.broadcast %cst_5 : f32 to vector<4x128xf32>
    %10 = arith.mulf %5, %9 : vector<4x128xf32>
    %11 = arith.truncf %10 : vector<4x128xf32> to vector<4x128xbf16>
    %c0_6 = arith.constant 0 : index
    %c0_7 = arith.constant 0 : index
    %12 = vector.load %arg2[%c0_6, %c0_7] : memref<8x128xbf16, #tpu.memory_space<vmem>>, vector<8x128xbf16>
    %13 = arith.extf %12 : vector<8x128xbf16> to vector<8x128xf32>
    %14 = arith.mulf %13, %13 : vector<8x128xf32>
    %cst_8 = arith.constant dense<0.000000e+00> : vector<8xf32>
    %15 = vector.multi_reduction <add>, %14, %cst_8 [1] : vector<8x128xf32> to vector<8xf32>
    %16 = vector.shape_cast %15 : vector<8xf32> to vector<8x1xf32>
    %cst_9 = arith.constant dense<0.000000e+00> : vector<8x4xf32>
    %17 = tpu.matmul %12, %11, %cst_9 {dimension_numbers = #tpu.dot_dimension_numbers<[1], [1], [0], [0], [0, 0, 1, 0], [], []>} : vector<8x128xbf16>, vector<4x128xbf16>, vector<8x4xf32> -> vector<8x4xf32>
    %18 = vector.broadcast %16 : vector<8x1xf32> to vector<8x4xf32>
    %19 = vector.broadcast %8 : vector<1x4xf32> to vector<8x4xf32>
    %20 = arith.addf %18, %19 : vector<8x4xf32>
    %21 = arith.addf %20, %17 : vector<8x4xf32>
    %cst_10 = arith.constant 0.000000e+00 : f32
    %22 = vector.broadcast %cst_10 : f32 to vector<8x4xf32>
    %23 = arith.maximumf %21, %22 : vector<8x4xf32>
    %24 = math.sqrt %23 : vector<8x4xf32>
    %cst_11 = arith.constant 0.000000e+00 : f32
    %25 = vector.broadcast %cst_11 : f32 to vector<8x4xf32>
    %26 = arith.subf %25, %24 : vector<8x4xf32>
    %c0_12 = arith.constant 0 : index
    %c0_13 = arith.constant 0 : index
    %27 = vector.load %arg3[%c0_12, %c0_13] : memref<8x4xf32, #tpu.memory_space<vmem>>, vector<8x4xf32>
    tpu.vector_store %arg3[%c0_12, %c0_13], %26 {strides = array<i32>} : memref<8x4xf32, #tpu.memory_space<vmem>>, vector<8x4xf32>,
    return
  }
  func.func @transform_0(%arg0: i32) -> (i32, i32, i32) {
    %c0_i32 = arith.constant 0 : i32
    %c0_i32_0 = arith.constant 0 : i32
    %c0_i32_1 = arith.constant 0 : i32
    %c0_i32_2 = arith.constant 0 : i32
    return %c0_i32, %c0_i32_0, %c0_i32_1 : i32, i32, i32
  }
  func.func @transform_1(%arg0: i32) -> (i32, i32) {
    %c0_i32 = arith.constant 0 : i32
    %c0_i32_0 = arith.constant 0 : i32
    return %arg0, %c0_i32 : i32, i32
  }
  func.func @transform_2(%arg0: i32) -> (i32, i32) {
    %c0_i32 = arith.constant 0 : i32
    %c0_i32_0 = arith.constant 0 : i32
    return %arg0, %c0_i32 : i32, i32
  }
}

</mosaic_0001>

<bundles_post_ra>
// kernel: tpu_custom_call.1
= control target key start
LH: loop header
LB: loop body
LE: loop exit
PB: predicated region body
PF: predicated region fallthrough
CT: control target
= control target key end

     0   :  { %7 = vsyncpa [#allocation3], 0  ;;  %s813_s0 = inlined_call_operand.hbm [shape: f32[4,8,128], index: 0, kind: input, shape index: {}]   ;;  %s814_s1 = inlined_call_operand.hbm [shape: bf16[16,128], index: 1, kind: input, shape index: {}]   ;;  %s815_s2 = inlined_call_operand.vmem [shape: f32[16,4], index: 2, kind: output, shape index: {}]  }
   0x1   :  { %8 = vsyncpa [#allocation5], 0 }
   0x2   :  { %10 = vsyncpa [#allocation5 + $0x1], 0  ;;  %s664_s9 = smov 0   ;;  %s666_s10 = smov 0  }
   0x3   :  { %s668_s11 = smov 0   ;;  %s670_s12 = smov 0  }
   0x4 LB: > { %s683_s13 = sadd.s32 4294967295, %s640_s12   ;;  %p57_p0 = scmp.ne.s32.totalorder %s632_s10, %s628_s9  ;;  %s640_s12 = sphi %s670_s12, %s830_s12   ;;  %s636_s11 = sphi %s668_s11, %s829_s11   ;;  %s632_s10 = sphi %s666_s10, %s828_s10   ;;  %s628_s9 = sphi %s664_s9, %s827_s9  }
   0x5   : > { %p816_p1 = scmp.eq.s32.totalorder %s683_s13, 0  ;;  %p461_p2 = scmp.ge.s32.totalorder %s640_s12, 1 }
   0x6   : > { %p94_p3 = scmp.lt.s32.totalorder %s640_s12, 3  ;;  %s642_s16 = smov [#allocation2]  }
   0x7   : > { %p691_p4 = por %p816_p1, %p57_p0  ;;  %s106_s17 = sshll.u32 %s642_s16, 4  ;;  %s107_s17 = int_to_ptr.vmem [resolvable:$true] %s106_s17 }
   0x8   : > { %p695_p5 = pnand %p461_p2, %p94_p3  ;;  %s708_s19 = sadd.s32 1, %s640_s12  }
   0x9   : > { %s819_s14 = scalar_select %p691_p4, 1, 0 }
   0xa   : > { %s820_s15 = scalar_select %p695_p5, 1, 0 }
   0xb   : > { %p493_p6 = pneg %p695_p5  ;;  %s44_s20 = sadd.s32 1, %s636_s11 }
   0xc   : > { %s41_s21 = ssub.s32 %s640_s12, %s708_s19  ;;  %s544_s24 = scalar_lea.hbm %s813_s0, 512 }
   0xd   : > { %p703_p7 = pnand %p493_p6, %p816_p1  ;;  %p545_p8 = scmp.ne.s32.totalorder %s813_s0, %s544_s24 }
   0xe   : > { %p551_p12 = scmp.lt.u32.totalorder %s544_s24, %s813_s0 }
   0xf   : > { %p546_p9 = pneg %p703_p7 }
  0x11   : > { %p547_p10 = pnand %p546_p9, %p545_p8 }
  0x13   : > { %p548_p11 = pneg %p547_p10 }
  0x15   : > { %p553_p13 = pnand %p551_p12, %p548_p11 }
  0x17   : > { %556 = shalt.err (!%p553_p13)
}
  0x18   : > { %s557_s29 = scalar_lea.vmem %s107_s17, 512  ;;  %p565_p6 = scmp.lt.s32.totalorder %s107_s17, %s107_s17 }
  0x19   : > { %p558_p0 = scmp.ne.s32.totalorder %s107_s17, %s557_s29  ;;  %p566_p1 = scmp.lt.s32.totalorder %s557_s29, %s557_s29 }
  0x1b   : > { %p560_p2 = pnand %p558_p0, %p546_p9  ;;  %p567_p4 = por %p566_p1, %p565_p6 }
  0x1d   : > { %p561_p3 = pneg %p560_p2 }
  0x1f   : > { %p568_p5 = pnand %p567_p4, %p561_p3 }
  0x21   : > { %571 = shalt.err (!%p568_p5)
}
  0x22   : > { %s643_s30 = smov 128   ;;  %s644_s3 = smov 8  }
  0x23   : > { %496 = dma.hbm_to_vmem [thread:$0]  (!%p703_p7), %s813_s0, 512, %s107_s17, [#allocation3], %s643_s30, %s643_s30, %s644_s3  }
  0x24   : > { %p42_p8 = scmp.eq.s32.totalorder %s41_s21, 0  ;;  %p51_p9 = scmp.ne.s32.totalorder %s636_s11, %s632_s10 }
  0x25   : > { %p52_p1 = scmp.eq.s32.totalorder %s640_s12, 0  ;;  %p502_p4 = scmp.lt.s32.totalorder %s640_s12, 2 }
  0x26   : > { %s734_s6 = scalar_select %p42_p8, %s636_s11, %s44_s20  }
  0x27   : > { %p53_p5 = por %p52_p1, %p51_p9  ;;  %s120_s7 = sand.u32 1, %s636_s11  }
  0x28   : > { %s464_s8 = sshll.u32 %s120_s7, 2  ;;  %s465_s9 = sshll.u32 %s640_s12, 6 }
  0x29   : > { %s741_s23 = scalar_lea.hbm %s814_s1, %s465_s9  ;;  %s124_s17 = scalar_lea.vmem [#allocation4], %s464_s8 }
  0x2a   : > { %s131_s18 = sshll.u32 %s124_s17, 4  ;;  %p745_p7 = pnand %p502_p4, %p53_p5  ;;  %s743_s18 = int_to_ptr.vmem [resolvable:$true] %s131_s18 }
  0x2b   : > { %s121_s12 = scalar_lea.sflag [#allocation5], %s120_s7  ;;  %s572_s21 = scalar_lea.hbm %s741_s23, 64 }
  0x2c   : > { %p573_p10 = scmp.ne.s32.totalorder %s741_s23, %s572_s21  ;;  %p574_p11 = pneg %p745_p7 }
  0x2d   : > { %s577_s26 = scalar_lea.hbm %s814_s1, 128  ;;  %p578_p0 = scmp.lt.u32.totalorder %s741_s23, %s814_s1 }
  0x2e   : > { %p575_p12 = pnand %p574_p11, %p573_p10  ;;  %p579_p2 = scmp.lt.u32.totalorder %s577_s26, %s572_s21 }
  0x2f   : > { %p581_p6 = scmp.lt.u32.totalorder %s572_s21, %s741_s23 }
  0x30   : > { %p576_p13 = pneg %p575_p12  ;;  %p580_p3 = por %p579_p2, %p578_p0 }
  0x32   : > { %p582_p8 = por %p581_p6, %p580_p3 }
  0x34   : > { %p583_p9 = pnand %p582_p8, %p576_p13 }
  0x36   : > { %586 = shalt.err (!%p583_p9)
}
  0x37   : > { %s587_s29 = scalar_lea.vmem %s743_s18, 64  ;;  %s645_s30 = smov [#allocation4]  }
  0x38   : > { %p588_p1 = scmp.ne.s32.totalorder %s743_s18, %s587_s29  ;;  %s592_s3 = sshll.u32 %s645_s30, 4  ;;  %s593_s3 = int_to_ptr.vmem [resolvable:$false] %s592_s3 }
  0x39   : > { %s594_s4 = scalar_lea.vmem %s593_s3, 128  ;;  %p595_p10 = scmp.lt.s32.totalorder %s743_s18, %s593_s3 }
  0x3a   : > { %p590_p4 = pnand %p588_p1, %p574_p11  ;;  %p596_p12 = scmp.lt.s32.totalorder %s594_s4, %s587_s29 }
  0x3c   : > { %p591_p5 = pneg %p590_p4  ;;  %p597_p0 = por %p596_p12, %p595_p10 }
  0x3e   : > { %p598_p2 = pnand %p597_p0, %p591_p5 }
  0x40   : > { %601 = shalt.err (!%p598_p2)
}
  0x41   : > { %500 = dma.hbm_to_vmem [thread:$0]  (!%p745_p7), %s741_s23, 64, %s743_s18, %s121_s12  }
  0x42   : > { %p823_p13 = scmp.ne.s32.totalorder %s820_s15, 0 }
  0x43   : > { %p824_p11 = scmp.eq.s32.totalorder (!%p823_p13), %s683_s13, 0 }
  0x44   : > { %140 = sbr.rel (%p823_p13) target bundleno = 351 (0x15f), region = 28 }
  0x4b   : > { %619 = dma.done.wait (%p824_p11), [#allocation3], 512   ;;  %p825_p3 = pmov %p824_p11 }
  0x4c   : > { %s146_s5 = sand.u32 1, %s632_s10   ;;  %p826_p6 = scmp.ne.s32.totalorder %s819_s14, 0 }
  0x4d   : > { %621 = vsyncadd (%p825_p3), [#allocation3], 4294966784  ;;  %s468_s7 = sshll.u32 %s146_s5, 2  ;;  %s147_s8 = scalar_lea.sflag [#allocation5], %s146_s5 }
  0x4e   : > { %s150_s9 = scalar_lea.vmem [#allocation4], %s468_s7 }
  0x4f   : > { %623 = dma.done.wait (%p826_p6), %s147_s8, 64  }
  0x50   : > { %625 = vsyncadd (%p826_p6), %s147_s8, 4294967232  ;;  %v646_v0 = vmov 0.0   ;;  %vm647_vm0 = vmmov 0   ;;  %v175_v1 = vld [vmem:[#allocation2] sm:$0xff]  ;;  %v176_v2 = vld [vmem:[#allocation2 + $0x8] sm:$0xff]  ;;  %vm223_vm1 = vcmask 1041409  }
  0x51   : > { %476 = vmatprep.subr.mxu0 %v646_v0  ;;  %481 = vmatprep.subr.bf16.mxu1 %v646_v0  ;;  %v177_v3 = vld [vmem:[#allocation2 + $0x10] sm:$0xff]  ;;  %v178_v4 = vld [vmem:[#allocation2 + $0x18] sm:$0xff]  ;;  %v179_v5 = vrot.slane %v175_v1, 4  ;;  %v185_v6 = vrot.slane %v176_v2, 4  ;;  %v785_v8 = vld [vmem:[%s150_s9] sm:$0xf] }
  0x52   : > { %478 = vmatprep.mubr.msk.f32.mxu0 %vm647_vm0, %v646_v0  ;;  %483 = vmatprep.mubr.msk.bf16.mxu1 %vm647_vm0, %v646_v0  ;;  %v191_v7 = vrot.slane %v177_v3, 4  ;;  %v197_v9 = vrot.slane %v178_v4, 4  ;;  %v309_v10 = vunpack.c.l.bf16 %v785_v8  ;;  %vm225_vm2 = vcmask 1042434   ;;  %p170_p7 = scmp.lt.s32.totalorder %s683_s13, 1 }
  0x53   : > { %v180_v11 = vadd.f32 %v179_v5, %v175_v1  ;;  %v186_v12 = vadd.f32 %v185_v6, %v176_v2  ;;  %vm227_vm3 = vcmask 1043459   ;;  %v648_v1 = vmov 1.0  }
  0x54   : > { %v192_v13 = vadd.f32 %v191_v7, %v177_v3  ;;  %v198_v14 = vadd.f32 %v197_v9, %v178_v4  ;;  %v310_v15 = vmul.f32 %v309_v10, %v309_v10  ;;  %v366_v4 = vlaneseq  ;;  %s832_s13 = smov (!%p170_p7, %s683_s13), 1 }
  0x55   : > { %v181_v16 = vrot.slane %v180_v11, 2  ;;  %v187_v17 = vrot.slane %v186_v12, 2  ;;  %s469_s14 = sshll.u32 %s832_s13, 3  ;;  %vm381_vm6 = vcmask 31744  }
  0x56   : > { %v193_v18 = vrot.slane %v192_v13, 2  ;;  %v199_v19 = vrot.slane %v198_v14, 2  ;;  %311 = vadd.xlane.f32.xlu0 %v310_v15  ;;  %v367_v5 = vshrl.u32 %v366_v4, 7  ;;  %s173_s22 = scalar_lea.vmem %s815_s2, %s469_s14 }
  0x57   : > { %v182_v20 = vadd.f32 %v181_v16, %v180_v11  ;;  %v188_v21 = vadd.f32 %v187_v17, %v186_v12 }
  0x58   : > { %v194_v22 = vadd.f32 %v193_v18, %v192_v13  ;;  %v200_v23 = vadd.f32 %v199_v19, %v198_v14  ;;  %v368_v7 = vsub.s32 0, %v367_v5 }
  0x59   : > { %v183_v24 = vrot.slane %v182_v20, 1  ;;  %v189_v25 = vrot.slane %v188_v21, 1 }
  0x5a   : > { %v195_v26 = vrot.slane %v194_v22, 1  ;;  %v201_v27 = vrot.slane %v200_v23, 1 }
  0x5b   : > { %v184_v28 = vadd.f32 %v183_v24, %v182_v20  ;;  %v190_v29 = vadd.f32 %v189_v25, %v188_v21 }
  0x5c   : > { %v196_v30 = vadd.f32 %v195_v26, %v194_v22  ;;  %v202_v31 = vadd.f32 %v201_v27, %v200_v23 }
  0x5d   : > { %v203_v32 = vmul.f32 0.125, %v184_v28  ;;  %v204_v33 = vmul.f32 0.125, %v190_v29 }
  0x5e   : > { %v205_v34 = vmul.f32 0.125, %v196_v30  ;;  %v206_v35 = vmul.f32 0.125, %v202_v31 }
  0x5f   : > { %v207_v36 = vpack.c.bf16 %v203_v32, %v203_v32  ;;  %v208_v37 = vpack.c.bf16 %v204_v33, %v204_v33 }
  0x60   : > { %v209_v38 = vpack.c.bf16 %v205_v34, %v205_v34  ;;  %v210_v39 = vpack.c.bf16 %v206_v35, %v206_v35 }
  0x61   : > { %v211_v40 = vunpack.c.l.bf16 %v207_v36  ;;  %v212_v41 = vunpack.c.l.bf16 %v208_v37 }
  0x62   : > { %v213_v42 = vunpack.c.l.bf16 %v209_v38  ;;  %v214_v43 = vunpack.c.l.bf16 %v210_v39 }
  0x63   : > { %v215_v44 = vmul.f32 %v211_v40, %v211_v40  ;;  %v216_v45 = vmul.f32 %v212_v41, %v212_v41  ;;  %v300_v47 = vmul.f32 -2.0, %v211_v40  ;;  %v301_v49 = vmul.f32 -2.0, %v212_v41 }
  0x64   : > { %v217_v46 = vmul.f32 %v213_v42, %v213_v42  ;;  %v218_v48 = vmul.f32 %v214_v43, %v214_v43  ;;  %v302_v50 = vmul.f32 -2.0, %v213_v42  ;;  %v303_v51 = vmul.f32 -2.0, %v214_v43 }
  0x65   : > { %v224_v52 = vsel %vm223_vm1, %v216_v45, %v215_v44  ;;  %v304_v53 = vpack.c.bf16 %v300_v47, %v300_v47  ;;  %v305_v55 = vpack.c.bf16 %v301_v49, %v301_v49 }
  0x66   : > { %v226_v54 = vsel %vm225_vm2, %v217_v46, %v224_v52  ;;  %v306_v56 = vpack.c.bf16 %v302_v50, %v302_v50  ;;  %v307_v57 = vpack.c.bf16 %v303_v51, %v303_v51 }
  0x67   : > { %v228_v58 = vsel %vm227_vm3, %v218_v48, %v226_v54  ;;  %v317_v59 = vunpack.c.l.b16 %v304_v53  ;;  %v318_v60 = vunpack.c.l.b16 %v305_v55 }
  0x68   : > { %477 = vmatpush3.xpose.msra.mxu0 %v228_v58  ;;  %v319_v61 = vunpack.c.l.b16 %v306_v56  ;;  %v320_v62 = vunpack.c.l.b16 %v307_v57 }
  0x69   : > { %v321_v63 = vsel %vm223_vm1, %v318_v60, %v317_v59 }
  0x6a   : > { %v322_v0 = vsel %vm225_vm2, %v319_v61, %v321_v63 }
  0x6b   : > { %479 = vmatmul.mubr.f32.vlgmr.msra.gmra.mrb[0].mxu0 %v648_v1  ;;  %v323_v2 = vsel %vm227_vm3, %v320_v62, %v322_v0 }
  0x6c   : > { %v324_v3 = vpack.c.b16 %v323_v2, %v323_v2 }
  0x6e   : > { %482 = vmatpush3.bf16.xpose.msra.mxu1 %v324_v3 }
  0x75   : > { %484 = vmatmul.mubr.bf16.vlgmr.msra.gmra.mrb[0].mxu1 %v785_v8 }
  0xe3   : > { %v312_v11 = vpop.xlane.xlu0 %311 }
 0x13e   : > { %v296_v6 = vpop.f32.mrb[0].mxu0 }
 0x13f   : > { %v480_v9 = vpop.f32.mrb[1].mxu0  ;;  %v369_v10 = vrot.slane %v296_v6, %v368_v7 }
 0x141   : > { %v370_v12 = vadd.f32 %v369_v10, %v312_v11 }
 0x148   : > { %v360_v13 = vpop.f32.mrb[0].mxu1 }
 0x149   : > { %v371_v14 = vadd.f32 %v370_v12, %v360_v13  ;;  %v485_v15 = vpop.f32.mrb[1].mxu1 }
 0x14a   : > { %v363_v16 = vpop.f32.mrb[2].mxu1 }
 0x14b   : > { %v372_v17 = vmax.f32 %v371_v14, 0.0  ;;  %v486_v18 = vpop.f32.mrb[3].mxu1 }
 0x14d   : > { %542 = vrsqrt.f32 %v372_v17  ;;  %vm375_vm4 = vcmp.eq.f32.partialorder %v372_v17, inf  ;;  %v378_v20 = vand.u32 2147483648, %v372_v17  ;;  %vm377_vm5 = vcmp.eq.f32.partialorder %v372_v17, 0.0 }
 0x157   : > { %v543_v8 = vpop.eup %542 }
 0x158   : > { %v374_v19 = vmul.f32 %v543_v8, %v372_v17 }
 0x15a   : > { %v376_v21 = vsel %vm375_vm4, %v372_v17, %v374_v19 }
 0x15b   : > { %v379_v22 = vsel %vm377_vm5, %v378_v20, %v376_v21 }
 0x15c   : > { %v380_v23 = vsub.f32 0.0, %v379_v22 }
 0x15e   : > { %382 = vst.msk [vmem:[%s173_s22] sm:$0xff] %vm381_vm6, %v380_v23 }
 0x15f PF: > { %p13_p8 = scmp.ge.s32.totalorder %s708_s19, 4   ;;  %s827_s9 = smov %s632_s10 }
 0x160   : > { %s828_s10 = smov %s636_s11  ;;  %s829_s11 = smov %s734_s6 }
 0x161   : > { %s830_s12 = smov %s708_s19  ;;  %15 = sbr.rel (!%p13_p8) target bundleno = 4 (0x4), region = 73 }
 0x168   :  { %402 = vsyncpa [#allocation3], 1 }
 0x169   :  { %404 = vsyncpa [#allocation3 + $0x1], 1 }
 0x16a   :  { %405 = vsyncpa [#allocation5], 1 }
 0x16b   :  { %407 = vsyncpa [#allocation5 + $0x1], 1 }

</bundles_post_ra>
